<compile_context>
chip_gen: v7x
topology: tpu7x:2x2x1
jax: 0.10.0
libtpu: 0.0.40
codegen_flags: <defaults>
</compile_context>

<pallas_src>
import jax
import jax.numpy as jnp
from jax.experimental import pallas as pl
from jax.experimental.pallas import tpu as pltpu


def integrate_kernel(w_ref, adj_ref, out_ref):
    # w_ref:   (G,) float32 softmax weights in SMEM (scalar prefetch)
    # adj_ref: (G, tile_m, tile_n) adjacency tile in VMEM (native dtype)
    # out_ref: (tile_m, tile_n) output tile
    G = adj_ref.shape[0]
    acc = w_ref[0] * adj_ref[0].astype(jnp.float32)
    for g in range(1, G):  # G is small & static -> unrolled accumulate
        acc = acc + w_ref[g] * adj_ref[g].astype(jnp.float32)
    out_ref[...] = acc.astype(out_ref.dtype)


def _chip_info():
    """(physical VMEM bytes per core, has >=2 TensorCores per chip)."""
    vmem_cap = 128 * (1 << 20)
    try:
        info = pltpu.get_tpu_info()
        cap = getattr(info, "vmem_capacity_bytes", None)
        if cap:
            vmem_cap = int(cap)
    except Exception:
        pass
    multi_tc = False
    try:
        kind = jax.devices()[0].device_kind.lower()
        multi_tc = "v7" in kind  # v7x: 2 TensorCores / chip
    except Exception:
        pass
    # 64 MiB-class VMEM is the v7x signature even if device_kind is opaque.
    if vmem_cap <= 80 * (1 << 20):
        multi_tc = True
    return vmem_cap, multi_tc


def _largest_fitting(N, align, cap, fits):
    """Largest multiple of `align` that divides N, <= cap, and satisfies fits(t)."""
    if N % align != 0:
        return None
    t = (min(cap, N) // align) * align
    while t >= align:
        if N % t == 0 and fits(t):
            return t
        t -= align
    return None


def _auto_tiles(G, N, itemsize, out_itemsize, budget_bytes, multi_tc):
    # dtype-aware sublane alignment: 8 for 4B, 16 for 2B, 32 for 1B dtypes
    align_m = max(8, 32 // max(1, itemsize))

    def footprint(tm, tn):
        # double-buffered adj block + double-buffered out block
        return 2 * (G * tm * tn * itemsize) + 2 * (tm * tn * out_itemsize)

    # Lane axis: prefer the full row -> contiguous HBM runs, lane-dense stores.
    tile_n = N
    tile_m = _largest_fitting(
        N, align_m, min(N, 2048), lambda t: footprint(t, N) <= budget_bytes
    )
    if tile_m is None:
        # Full-width rows don't fit at any aligned tile_m (or N is not
        # sublane-aligned): fall back to minimal rows and shrink columns.
        tile_m = align_m if N % align_m == 0 else N
        tn = _largest_fitting(
            N, 128, N, lambda t: footprint(tile_m, t) <= budget_bytes
        )
        tile_n = tn if tn is not None else N  # full-dim block is always legal

    # Dual-TC chips (v7x): keep an even, >=2 parallel step count so both
    # TensorCores split the grid evenly. Smaller tile_m always still fits.
    if multi_tc and N % align_m == 0:
        steps = (N // tile_m) * (N // tile_n)
        if steps % 2 != 0:
            t = tile_m
            while t >= align_m:
                if N % t == 0 and ((N // t) * (N // tile_n)) % 2 == 0:
                    tile_m = t
                    break
                t -= align_m

    return tile_m, tile_n, footprint(tile_m, tile_n)


def integrate(temp, adj, *, tile_m=None, tile_n=None, out_dtype=None):
    """temp: (G,) logits; adj: (G, N, N) dense stack of adjacency matrices."""
    G, N, N2 = adj.shape
    assert N == N2, "adjacency matrices must be square"
    itemsize = jnp.dtype(adj.dtype).itemsize

    # Output dtype: f32 by default (matches the PyTorch module's arithmetic);
    # callers may pass e.g. bf16 to halve output writeback traffic.
    if out_dtype is None:
        out_dtype = jnp.promote_types(adj.dtype, jnp.float32)
    out_itemsize = jnp.dtype(out_dtype).itemsize

    vmem_cap, multi_tc = _chip_info()
    if vmem_cap <= 80 * (1 << 20):          # v7x-class: 64 MiB VMEM per TC
        budget = 28 * (1 << 20)
        limit_cap = 52 * (1 << 20)
    else:                                   # v5e / v6e: 128 MiB VMEM
        budget = 48 * (1 << 20)
        limit_cap = 100 * (1 << 20)

    auto_m, auto_n, fp = _auto_tiles(G, N, itemsize, out_itemsize, budget, multi_tc)
    tile_m = auto_m if tile_m is None else tile_m
    tile_n = auto_n if tile_n is None else tile_n
    assert N % tile_m == 0 and N % tile_n == 0, "tiles must divide N"
    fp = 2 * (G * tile_m * tile_n * itemsize) + 2 * (tile_m * tile_n * out_itemsize)

    # Softmax over the G graph logits: tiny op, done once here, sent to SMEM.
    w = jax.nn.softmax(temp.astype(jnp.float32).reshape(G))

    grid = (N // tile_m, N // tile_n)

    # footprint already accounts for double-buffering; add small headroom only.
    vmem_limit = int(min(limit_cap, max(16 * (1 << 20), fp + 4 * (1 << 20))))

    cost = pl.CostEstimate(
        flops=2 * G * N * N,
        transcendentals=0,
        bytes_accessed=G * N * N * itemsize + N * N * out_itemsize + G * 4,
    )

    return pl.pallas_call(
        integrate_kernel,
        out_shape=jax.ShapeDtypeStruct((N, N), out_dtype),
        grid_spec=pltpu.PrefetchScalarGridSpec(
            num_scalar_prefetch=1,          # w -> SMEM, read as scalars
            grid=grid,
            in_specs=[
                # adj: all G graphs, a (tile_m, tile_n) window, native dtype
                pl.BlockSpec((G, tile_m, tile_n), lambda i, j, w: (0, i, j)),
            ],
            out_specs=pl.BlockSpec((tile_m, tile_n), lambda i, j, w: (i, j)),
        ),
        compiler_params=pltpu.CompilerParams(
            dimension_semantics=("parallel", "parallel"),
            vmem_limit_bytes=vmem_limit,
        ),
        cost_estimate=cost,
    )(w, adj)


if __name__ == "__main__":
    G, N = 4, 128
    key = jax.random.PRNGKey(0)
    k_adj, _ = jax.random.split(key)

    # Deterministic parameter init: module does self.temp.data.fill_(1)
    temp = jnp.ones((G,), dtype=jnp.float32)
    # Synthetic dense adjacency stack (values in [0, 1))
    adj = jax.random.uniform(k_adj, (G, N, N), dtype=jnp.float32)

    # TODO(synk): the module's .to_sparse()/.to_dense() round-trips are
    # storage-format conversions only; the dense weighted sum is computed here.
    out = integrate(temp, adj)
    out = jax.block_until_ready(out)

    # Reference (plain JAX) for correctness check
    w_ref = jax.nn.softmax(temp)
    ref = jnp.einsum("g,gmn->mn", w_ref, adj)
    assert out.shape == (N, N)
    assert jnp.allclose(out, ref, atol=1e-5, rtol=1e-5)

    print("KERNEL_OK")
</pallas_src>

<mosaic_0001>
module attributes {stable_mosaic.version = 11 : i64} {
  func.func @integrate_kernel(%arg0: i32, %arg1: i32, %arg2: memref<4xf32, #tpu.memory_space<smem>>, %arg3: memref<4x128x128xf32, #tpu.memory_space<vmem>>, %arg4: memref<128x128xf32, #tpu.memory_space<vmem>>) attributes {dimension_semantics = [#tpu.dimension_semantics<parallel>, #tpu.dimension_semantics<parallel>], iteration_bounds = array<i64: 1, 1>, scalar_prefetch = 1 : i64, scratch_operands = 0 : i64, tpu.core_type = #tpu.core_type<tc>, window_params = [{transform_indices = @transform_0, window_bounds = array<i64: 4, 128, 128>}, {transform_indices = @transform_1, window_bounds = array<i64: 128, 128>}]} {
    %c0 = arith.constant 0 : index
    %0 = memref.load %arg2[%c0] : memref<4xf32, #tpu.memory_space<smem>>
    %c0_0 = arith.constant 0 : index
    %c0_1 = arith.constant 0 : index
    %c0_2 = arith.constant 0 : index
    %1 = vector.load %arg3[%c0_0, %c0_1, %c0_2] : memref<4x128x128xf32, #tpu.memory_space<vmem>>, vector<1x128x128xf32>
    %2 = vector.shape_cast %1 : vector<1x128x128xf32> to vector<128x128xf32>
    %3 = vector.broadcast %0 : f32 to vector<128x128xf32>
    %4 = arith.mulf %3, %2 : vector<128x128xf32>
    %c1 = arith.constant 1 : index
    %5 = memref.load %arg2[%c1] : memref<4xf32, #tpu.memory_space<smem>>
    %c1_3 = arith.constant 1 : index
    %c0_4 = arith.constant 0 : index
    %c0_5 = arith.constant 0 : index
    %6 = vector.load %arg3[%c1_3, %c0_4, %c0_5] : memref<4x128x128xf32, #tpu.memory_space<vmem>>, vector<1x128x128xf32>
    %7 = vector.shape_cast %6 : vector<1x128x128xf32> to vector<128x128xf32>
    %8 = vector.broadcast %5 : f32 to vector<128x128xf32>
    %9 = arith.mulf %8, %7 : vector<128x128xf32>
    %10 = arith.addf %4, %9 : vector<128x128xf32>
    %c2 = arith.constant 2 : index
    %11 = memref.load %arg2[%c2] : memref<4xf32, #tpu.memory_space<smem>>
    %c2_6 = arith.constant 2 : index
    %c0_7 = arith.constant 0 : index
    %c0_8 = arith.constant 0 : index
    %12 = vector.load %arg3[%c2_6, %c0_7, %c0_8] : memref<4x128x128xf32, #tpu.memory_space<vmem>>, vector<1x128x128xf32>
    %13 = vector.shape_cast %12 : vector<1x128x128xf32> to vector<128x128xf32>
    %14 = vector.broadcast %11 : f32 to vector<128x128xf32>
    %15 = arith.mulf %14, %13 : vector<128x128xf32>
    %16 = arith.addf %10, %15 : vector<128x128xf32>
    %c3 = arith.constant 3 : index
    %17 = memref.load %arg2[%c3] : memref<4xf32, #tpu.memory_space<smem>>
    %c3_9 = arith.constant 3 : index
    %c0_10 = arith.constant 0 : index
    %c0_11 = arith.constant 0 : index
    %18 = vector.load %arg3[%c3_9, %c0_10, %c0_11] : memref<4x128x128xf32, #tpu.memory_space<vmem>>, vector<1x128x128xf32>
    %19 = vector.shape_cast %18 : vector<1x128x128xf32> to vector<128x128xf32>
    %20 = vector.broadcast %17 : f32 to vector<128x128xf32>
    %21 = arith.mulf %20, %19 : vector<128x128xf32>
    %22 = arith.addf %16, %21 : vector<128x128xf32>
    %c0_12 = arith.constant 0 : index
    %c0_13 = arith.constant 0 : index
    %23 = vector.load %arg4[%c0_12, %c0_13] : memref<128x128xf32, #tpu.memory_space<vmem>>, vector<128x128xf32>
    tpu.vector_store %arg4[%c0_12, %c0_13], %22 {strides = array<i32>} : memref<128x128xf32, #tpu.memory_space<vmem>>, vector<128x128xf32>,
    return
  }
  func.func @transform_0(%arg0: i32, %arg1: i32, %arg2: memref<4xf32, #tpu.memory_space<smem>>) -> (i32, i32, i32) {
    %c0_i32 = arith.constant 0 : i32
    %c0_i32_0 = arith.constant 0 : i32
    return %c0_i32, %arg0, %arg1 : i32, i32, i32
  }
  func.func @transform_1(%arg0: i32, %arg1: i32, %arg2: memref<4xf32, #tpu.memory_space<smem>>) -> (i32, i32) {
    %c0_i32 = arith.constant 0 : i32
    return %arg0, %arg1 : i32, i32
  }
}

</mosaic_0001>

<bundles_post_ra>
// kernel: tpu_custom_call.1
= control target key start
LH: loop header
LB: loop body
LE: loop exit
PB: predicated region body
PF: predicated region fallthrough
CT: control target
= control target key end

     0   :  { %s450_s0 = inlined_call_operand.hbm [shape: f32[4], index: 0, kind: input, shape index: {}]   ;;  %s451_s1 = inlined_call_operand.hbm [shape: f32[4,128,128], index: 1, kind: input, shape index: {}]   ;;  %s452_s2 = inlined_call_operand.hbm [shape: f32[128,128], index: 2, kind: output, shape index: {}]  }
   0x1   :  { %s256_s11 = scalar_lea.hbm %s450_s0, 16 }
   0x2   :  { %p257_p0 = scmp.ne.s32.totalorder %s450_s0, %s256_s11  ;;  %p260_p1 = scmp.lt.u32.totalorder %s256_s11, %s450_s0 }
   0x4   :  { %p262_p2 = pnand %p260_p1, %p257_p0 }
   0x6   :  { %265 = shalt.err (!%p262_p2)  }
   0x7   :  { %s316_s16 = smov [#allocation3]  }
   0x8   :  { %8 = dma.hbm_to_smem %s450_s0, 16, %s316_s16, [#allocation2] }
   0x9   :  { %310 = dma.done.wait [#allocation2], 16 }
   0xa   :  { %311 = vsyncadd [#allocation2], 4294967280 }
   0xb   :  { %10 = sfence }
   0xc   :  { %11 = vsyncpa [#allocation5], 0 }
   0xd   :  { %12 = vsyncpa [#allocation6], 0  ;;  %s317_s19 = smov [#allocation4]   ;;  %s266_s23 = scalar_lea.hbm %s451_s1, 8192 }
   0xe   :  { %s18_s20 = sshll.u32 %s317_s19, 4  ;;  %p267_p3 = scmp.ne.s32.totalorder %s451_s1, %s266_s23  ;;  %s19_s20 = int_to_ptr.vmem [resolvable:$true] %s18_s20 }
   0xf   :  { %p270_p4 = scmp.lt.u32.totalorder %s266_s23, %s451_s1 }
  0x11   :  { %p272_p5 = pnand %p270_p4, %p267_p3 }
  0x13   :  { %275 = shalt.err (!%p272_p5)
}
  0x14   :  { %s276_s0 = scalar_lea.vmem %s19_s20, 8192  ;;  %p281_p7 = scmp.lt.s32.totalorder %s19_s20, %s19_s20 }
  0x15   :  { %p277_p6 = scmp.ne.s32.totalorder %s19_s20, %s276_s0  ;;  %p282_p8 = scmp.lt.s32.totalorder %s276_s0, %s276_s0 }
  0x17   :  { %p283_p9 = por %p282_p8, %p281_p7 }
  0x19   :  { %p284_p10 = pnand %p283_p9, %p277_p6 }
  0x1b   :  { %287 = shalt.err (!%p284_p10)
}
  0x1c   :  { %s318_s28 = smov 128   ;;  %s319_s29 = smov 8  }
  0x1d   :  { %24 = dma.hbm_to_vmem [thread:$0]  %s451_s1, 8192, %s19_s20, [#allocation5], %s318_s28, %s318_s28, %s319_s29  }
  0x1e   :  { %312 = dma.done.wait [#allocation5], 8192  }
  0x1f   :  { %313 = vsyncadd [#allocation5], 4294959104  ;;  %s28_s4 = sld [smem:[#allocation3]]  ;;  %s248_s5 = sld [smem:[#allocation3 + $0x1]]  ;;  %v29_v0 = vld [vmem:[#allocation4] sm:$0xff]  ;;  %v30_v10 = vld [vmem:[#allocation4 + $0x8] sm:$0xff] }
  0x20   :  { %s249_s6 = sld [smem:[#allocation3 + $0x2]]  ;;  %s250_s7 = sld [smem:[#allocation3 + $0x3]]  ;;  %v64_v2 = vld [vmem:[#allocation4 + $0x80] sm:$0xff]  ;;  %v65_v11 = vld [vmem:[#allocation4 + $0x88] sm:$0xff]  ;;  %v31_v18 = vld [vmem:[#allocation4 + $0x10] sm:$0xff] }
  0x21   :  { %v115_v4 = vld [vmem:[#allocation4 + $0x100] sm:$0xff]  ;;  %v116_v16 = vld [vmem:[#allocation4 + $0x108] sm:$0xff]  ;;  %v66_v23 = vld [vmem:[#allocation4 + $0x90] sm:$0xff]  ;;  %s320_s1 = smov [#allocation7]  }
  0x22   :  { %v166_v8 = vld [vmem:[#allocation4 + $0x180] sm:$0xff]  ;;  %v167_v17 = vld [vmem:[#allocation4 + $0x188] sm:$0xff]  ;;  %v117_v24 = vld [vmem:[#allocation4 + $0x110] sm:$0xff]  ;;  %s236_s8 = sshll.u32 %s320_s1, 4  ;;  %s237_s8 = int_to_ptr.vmem [resolvable:$true] %s236_s8 }
  0x23   :  { %v168_v25 = vld [vmem:[#allocation4 + $0x190] sm:$0xff]  ;;  %v32_v30 = vld [vmem:[#allocation4 + $0x18] sm:$0xff]  ;;  %v33_v38 = vld [vmem:[#allocation4 + $0x20] sm:$0xff]  ;;  %s288_s9 = scalar_lea.vmem %s237_s8, 2048  ;;  %p293_p12 = scmp.lt.s32.totalorder %s237_s8, %s237_s8 }
  0x24   :  { %v67_v31 = vld [vmem:[#allocation4 + $0x98] sm:$0xff]  ;;  %v68_v39 = vld [vmem:[#allocation4 + $0xa0] sm:$0xff]  ;;  %v34_v46 = vld [vmem:[#allocation4 + $0x28] sm:$0xff]  ;;  %p289_p11 = scmp.ne.s32.totalorder %s237_s8, %s288_s9  ;;  %p294_p13 = scmp.lt.s32.totalorder %s288_s9, %s288_s9 }
  0x25   :  { %v363_v1 = vstv %s28_s4  ;;  %v365_v3 = vstv %s248_s5  ;;  %v118_v32 = vld [vmem:[#allocation4 + $0x118] sm:$0xff]  ;;  %v119_v44 = vld [vmem:[#allocation4 + $0x120] sm:$0xff]  ;;  %v69_v51 = vld [vmem:[#allocation4 + $0xa8] sm:$0xff] }
  0x26   :  { %v46_v5 = vmul.f32 %v363_v1, %v29_v0  ;;  %v81_v6 = vmul.f32 %v365_v3, %v64_v2  ;;  %v369_v7 = vstv %s249_s6  ;;  %v371_v9 = vstv %s250_s7  ;;  %v169_v37 = vld [vmem:[#allocation4 + $0x198] sm:$0xff]  ;;  %v170_v45 = vld [vmem:[#allocation4 + $0x1a0] sm:$0xff]  ;;  %v120_v52 = vld [vmem:[#allocation4 + $0x128] sm:$0xff]  ;;  %p295_p0 = por %p294_p13, %p293_p12 }
  0x27   :  { %v132_v12 = vmul.f32 %v369_v7, %v115_v4  ;;  %v183_v13 = vmul.f32 %v371_v9, %v166_v8  ;;  %v47_v14 = vmul.f32 %v363_v1, %v30_v10  ;;  %v82_v15 = vmul.f32 %v365_v3, %v65_v11  ;;  %v171_v53 = vld [vmem:[#allocation4 + $0x1a8] sm:$0xff]  ;;  %v35_v58 = vld [vmem:[#allocation4 + $0x30] sm:$0xff]  ;;  %v36_v4 = vld [vmem:[#allocation4 + $0x38] sm:$0xff] }
  0x28   :  { %v97_v19 = vadd.f32 %v81_v6, %v46_v5  ;;  %v133_v20 = vmul.f32 %v369_v7, %v116_v16  ;;  %v184_v21 = vmul.f32 %v371_v9, %v167_v17  ;;  %v48_v22 = vmul.f32 %v363_v1, %v31_v18  ;;  %v70_v59 = vld [vmem:[#allocation4 + $0xb0] sm:$0xff]  ;;  %v71_v5 = vld [vmem:[#allocation4 + $0xb8] sm:$0xff]  ;;  %v37_v18 = vld [vmem:[#allocation4 + $0x40] sm:$0xff]  ;;  %p296_p1 = pnand %p295_p0, %p289_p11 }
  0x29   :  { %v98_v26 = vadd.f32 %v82_v15, %v47_v14  ;;  %v83_v27 = vmul.f32 %v365_v3, %v66_v23  ;;  %v134_v28 = vmul.f32 %v369_v7, %v117_v24  ;;  %v185_v29 = vmul.f32 %v371_v9, %v168_v25  ;;  %v121_v60 = vld [vmem:[#allocation4 + $0x130] sm:$0xff]  ;;  %v123_v24 = vld [vmem:[#allocation4 + $0x140] sm:$0xff] }
  0x2a   :  { %v148_v33 = vadd.f32 %v132_v12, %v97_v19  ;;  %v49_v34 = vmul.f32 %v363_v1, %v32_v30  ;;  %v84_v35 = vmul.f32 %v365_v3, %v67_v31  ;;  %v135_v36 = vmul.f32 %v369_v7, %v118_v32  ;;  %v172_v2 = vld [vmem:[#allocation4 + $0x1b0] sm:$0xff]  ;;  %v122_v12 = vld [vmem:[#allocation4 + $0x138] sm:$0xff]  ;;  %v72_v19 = vld [vmem:[#allocation4 + $0xc0] sm:$0xff] }
  0x2b   :  { %v149_v40 = vadd.f32 %v133_v20, %v98_v26  ;;  %v99_v41 = vadd.f32 %v83_v27, %v48_v22  ;;  %v186_v42 = vmul.f32 %v371_v9, %v169_v37  ;;  %v50_v43 = vmul.f32 %v363_v1, %v33_v38  ;;  %v174_v25 = vld [vmem:[#allocation4 + $0x1c0] sm:$0xff]  ;;  %v38_v26 = vld [vmem:[#allocation4 + $0x48] sm:$0xff]  ;;  %v39_v38 = vld [vmem:[#allocation4 + $0x50] sm:$0xff] }
  0x2c   :  { %v199_v47 = vadd.f32 %v183_v13, %v148_v33  ;;  %v100_v48 = vadd.f32 %v84_v35, %v49_v34  ;;  %v85_v49 = vmul.f32 %v365_v3, %v68_v39  ;;  %v136_v50 = vmul.f32 %v369_v7, %v119_v44  ;;  %v173_v13 = vld [vmem:[#allocation4 + $0x1b8] sm:$0xff]  ;;  %v73_v31 = vld [vmem:[#allocation4 + $0xc8] sm:$0xff]  ;;  %v74_v39 = vld [vmem:[#allocation4 + $0xd0] sm:$0xff] }
  0x2d   :  { %v200_v54 = vadd.f32 %v184_v21, %v149_v40  ;;  %v150_v55 = vadd.f32 %v134_v28, %v99_v41  ;;  %v187_v56 = vmul.f32 %v371_v9, %v170_v45  ;;  %v51_v57 = vmul.f32 %v363_v1, %v34_v46  ;;  %v124_v32 = vld [vmem:[#allocation4 + $0x148] sm:$0xff]  ;;  %v125_v44 = vld [vmem:[#allocation4 + $0x150] sm:$0xff] }
  0x2e   :  { %215 = vst [vmem:[#allocation7] sm:$0xff] %v199_v47  ;;  %v151_v61 = vadd.f32 %v135_v36, %v100_v48  ;;  %v101_v62 = vadd.f32 %v85_v49, %v50_v43  ;;  %v86_v63 = vmul.f32 %v365_v3, %v69_v51  ;;  %v137_v0 = vmul.f32 %v369_v7, %v120_v52  ;;  %v175_v37 = vld [vmem:[#allocation4 + $0x1c8] sm:$0xff]  ;;  %v176_v49 = vld [vmem:[#allocation4 + $0x1d0] sm:$0xff]  ;;  %v75_v51 = vld [vmem:[#allocation4 + $0xd8] sm:$0xff] }
  0x2f   :  { %216 = vst [vmem:[#allocation7 + $0x8] sm:$0xff] %v200_v54  ;;  %v201_v6 = vadd.f32 %v185_v29, %v150_v55  ;;  %v188_v8 = vmul.f32 %v371_v9, %v171_v53  ;;  %v52_v10 = vmul.f32 %v363_v1, %v35_v58  ;;  %v87_v11 = vmul.f32 %v365_v3, %v70_v59 }
  0x30   :  { %v202_v14 = vadd.f32 %v186_v42, %v151_v61  ;;  %v152_v15 = vadd.f32 %v136_v50, %v101_v62  ;;  %v102_v16 = vadd.f32 %v86_v63, %v51_v57  ;;  %v138_v17 = vmul.f32 %v369_v7, %v121_v60  ;;  %v40_v50 = vld [vmem:[#allocation4 + $0x58] sm:$0xff]  ;;  %v41_v62 = vld [vmem:[#allocation4 + $0x60] sm:$0xff] }
  0x31   :  { %217 = vst [vmem:[#allocation7 + $0x10] sm:$0xff] %v201_v6  ;;  %v103_v20 = vadd.f32 %v87_v11, %v52_v10  ;;  %v189_v21 = vmul.f32 %v371_v9, %v172_v2  ;;  %v53_v22 = vmul.f32 %v363_v1, %v36_v4  ;;  %v88_v23 = vmul.f32 %v365_v3, %v71_v5  ;;  %v177_v57 = vld [vmem:[#allocation4 + $0x1d8] sm:$0xff]  ;;  %v76_v63 = vld [vmem:[#allocation4 + $0xe0] sm:$0xff]  ;;  %v42_v10 = vld [vmem:[#allocation4 + $0x68] sm:$0xff] }
  0x32   :  { %218 = vst [vmem:[#allocation7 + $0x18] sm:$0xff] %v202_v14  ;;  %v203_v27 = vadd.f32 %v187_v56, %v152_v15  ;;  %v153_v28 = vadd.f32 %v137_v0, %v102_v16  ;;  %v139_v29 = vmul.f32 %v369_v7, %v122_v12  ;;  %v190_v30 = vmul.f32 %v371_v9, %v173_v13  ;;  %v126_v56 = vld [vmem:[#allocation4 + $0x158] sm:$0xff]  ;;  %v127_v6 = vld [vmem:[#allocation4 + $0x160] sm:$0xff]  ;;  %v77_v15 = vld [vmem:[#allocation4 + $0xe8] sm:$0xff] }
  0x33   :  { %v154_v33 = vadd.f32 %v138_v17, %v103_v20  ;;  %v104_v34 = vadd.f32 %v88_v23, %v53_v22  ;;  %v54_v35 = vmul.f32 %v363_v1, %v37_v18  ;;  %v89_v36 = vmul.f32 %v365_v3, %v72_v19  ;;  %v128_v16 = vld [vmem:[#allocation4 + $0x168] sm:$0xff]  ;;  %v43_v22 = vld [vmem:[#allocation4 + $0x70] sm:$0xff] }
  0x34   :  { %219 = vst [vmem:[#allocation7 + $0x20] sm:$0xff] %v203_v27  ;;  %v204_v40 = vadd.f32 %v188_v8, %v153_v28  ;;  %v140_v41 = vmul.f32 %v369_v7, %v123_v24  ;;  %v191_v42 = vmul.f32 %v371_v9, %v174_v25  ;;  %v55_v43 = vmul.f32 %v363_v1, %v38_v26  ;;  %v178_v8 = vld [vmem:[#allocation4 + $0x1e0] sm:$0xff]  ;;  %v78_v23 = vld [vmem:[#allocation4 + $0xf0] sm:$0xff] }
  0x35   :  { %v205_v45 = vadd.f32 %v189_v21, %v154_v33  ;;  %v155_v46 = vadd.f32 %v139_v29, %v104_v34  ;;  %v105_v47 = vadd.f32 %v89_v36, %v54_v35  ;;  %v90_v48 = vmul.f32 %v365_v3, %v73_v31  ;;  %v179_v21 = vld [vmem:[#allocation4 + $0x1e8] sm:$0xff]  ;;  %v129_v28 = vld [vmem:[#allocation4 + $0x170] sm:$0xff]  ;;  %v44_v34 = vld [vmem:[#allocation4 + $0x78] sm:$0xff] }
  0x36   :  { %220 = vst [vmem:[#allocation7 + $0x28] sm:$0xff] %v204_v40  ;;  %v141_v52 = vmul.f32 %v369_v7, %v124_v32  ;;  %v192_v53 = vmul.f32 %v371_v9, %v175_v37  ;;  %v56_v54 = vmul.f32 %v363_v1, %v39_v38  ;;  %v91_v55 = vmul.f32 %v365_v3, %v74_v39  ;;  %v180_v33 = vld [vmem:[#allocation4 + $0x1f0] sm:$0xff]  ;;  %v79_v35 = vld [vmem:[#allocation4 + $0xf8] sm:$0xff] }
  0x37   :  { %221 = vst [vmem:[#allocation7 + $0x30] sm:$0xff] %v205_v45  ;;  %v206_v58 = vadd.f32 %v190_v30, %v155_v46  ;;  %v156_v59 = vadd.f32 %v140_v41, %v105_v47  ;;  %v106_v60 = vadd.f32 %v90_v48, %v55_v43  ;;  %v142_v61 = vmul.f32 %v369_v7, %v125_v44  ;;  %v130_v40 = vld [vmem:[#allocation4 + $0x178] sm:$0xff] }
  0x38   :  { %v107_v0 = vadd.f32 %v91_v55, %v56_v54  ;;  %v193_v2 = vmul.f32 %v371_v9, %v176_v49  ;;  %v57_v4 = vmul.f32 %v363_v1, %v40_v50  ;;  %v92_v5 = vmul.f32 %v365_v3, %v75_v51  ;;  %v181_v45 = vld [vmem:[#allocation4 + $0x1f8] sm:$0xff] }
  0x39   :  { %222 = vst [vmem:[#allocation7 + $0x38] sm:$0xff] %v206_v58  ;;  %v207_v11 = vadd.f32 %v191_v42, %v156_v59  ;;  %v157_v12 = vadd.f32 %v141_v52, %v106_v60  ;;  %v143_v13 = vmul.f32 %v369_v7, %v126_v56  ;;  %v194_v14 = vmul.f32 %v371_v9, %v177_v57 }
  0x3a   :  { %v158_v17 = vadd.f32 %v142_v61, %v107_v0  ;;  %v108_v18 = vadd.f32 %v92_v5, %v57_v4  ;;  %v58_v19 = vmul.f32 %v363_v1, %v41_v62  ;;  %v93_v20 = vmul.f32 %v365_v3, %v76_v63 }
  0x3b   :  { %223 = vst [vmem:[#allocation7 + $0x40] sm:$0xff] %v207_v11  ;;  %v208_v24 = vadd.f32 %v192_v53, %v157_v12  ;;  %v144_v25 = vmul.f32 %v369_v7, %v127_v6  ;;  %v195_v26 = vmul.f32 %v371_v9, %v178_v8  ;;  %v59_v27 = vmul.f32 %v363_v1, %v42_v10 }
  0x3c   :  { %v209_v29 = vadd.f32 %v193_v2, %v158_v17  ;;  %v159_v30 = vadd.f32 %v143_v13, %v108_v18  ;;  %v109_v31 = vadd.f32 %v93_v20, %v58_v19  ;;  %v94_v32 = vmul.f32 %v365_v3, %v77_v15 }
  0x3d   :  { %224 = vst [vmem:[#allocation7 + $0x48] sm:$0xff] %v208_v24  ;;  %v145_v36 = vmul.f32 %v369_v7, %v128_v16  ;;  %v196_v37 = vmul.f32 %v371_v9, %v179_v21  ;;  %v60_v38 = vmul.f32 %v363_v1, %v43_v22  ;;  %v95_v39 = vmul.f32 %v365_v3, %v78_v23 }
  0x3e   :  { %225 = vst [vmem:[#allocation7 + $0x50] sm:$0xff] %v209_v29  ;;  %v210_v41 = vadd.f32 %v194_v14, %v159_v30  ;;  %v160_v42 = vadd.f32 %v144_v25, %v109_v31  ;;  %v110_v43 = vadd.f32 %v94_v32, %v59_v27  ;;  %v146_v44 = vmul.f32 %v369_v7, %v129_v28 }
  0x3f   :  { %v111_v46 = vadd.f32 %v95_v39, %v60_v38  ;;  %v197_v47 = vmul.f32 %v371_v9, %v180_v33  ;;  %v61_v48 = vmul.f32 %v363_v1, %v44_v34  ;;  %v96_v49 = vmul.f32 %v365_v3, %v79_v35 }
  0x40   :  { %226 = vst [vmem:[#allocation7 + $0x58] sm:$0xff] %v210_v41  ;;  %v211_v50 = vadd.f32 %v195_v26, %v160_v42  ;;  %v161_v51 = vadd.f32 %v145_v36, %v110_v43  ;;  %v147_v52 = vmul.f32 %v369_v7, %v130_v40  ;;  %v198_v55 = vmul.f32 %v371_v9, %v181_v45 }
  0x41   :  { %v162_v53 = vadd.f32 %v146_v44, %v111_v46  ;;  %v112_v54 = vadd.f32 %v96_v49, %v61_v48 }
  0x42   :  { %227 = vst [vmem:[#allocation7 + $0x60] sm:$0xff] %v211_v50  ;;  %v212_v56 = vadd.f32 %v196_v37, %v161_v51 }
  0x43   :  { %v213_v57 = vadd.f32 %v197_v47, %v162_v53  ;;  %v163_v58 = vadd.f32 %v147_v52, %v112_v54 }
  0x44   :  { %228 = vst [vmem:[#allocation7 + $0x68] sm:$0xff] %v212_v56 }
  0x45   :  { %229 = vst [vmem:[#allocation7 + $0x70] sm:$0xff] %v213_v57  ;;  %v214_v1 = vadd.f32 %v198_v55, %v163_v58 }
  0x47   :  { %230 = vst [vmem:[#allocation7 + $0x78] sm:$0xff] %v214_v1 }
  0x48   :  { %299 = shalt.err (!%p296_p1)
}
  0x49   :  { %s300_s12 = scalar_lea.hbm %s452_s2, 2048 }
  0x4a   :  { %p301_p2 = scmp.ne.s32.totalorder %s452_s2, %s300_s12  ;;  %p304_p3 = scmp.lt.u32.totalorder %s300_s12, %s452_s2 }
  0x4c   :  { %p306_p4 = pnand %p304_p3, %p301_p2 }
  0x4e   :  { %309 = shalt.err (!%p306_p4)
}
  0x4f   :  { %242 = dma.vmem_to_hbm [thread:$0]  %s237_s8, 2048, %s452_s2, [#allocation6], %s318_s28, %s318_s28, %s319_s29  }
  0x50   :  { %314 = dma.done.wait [#allocation6], 2048  }
  0x51   :  { %315 = vsyncadd [#allocation6], 4294965248 }
  0x52   :  { %246 = vsyncpa [#allocation5], 1 }
  0x53   :  { %247 = vsyncpa [#allocation6], 1 }

</bundles_post_ra>
